<compile_context>
chip_gen: v7x
topology: tpu7x:2x2x1
jax: 0.10.0
libtpu: 0.0.40
codegen_flags: <defaults>
</compile_context>

<pallas_src>
import functools
import math

import jax
import jax.numpy as jnp
from jax import lax
from jax.experimental import pallas as pl
from jax.experimental.pallas import tpu as pltpu

# ---- Model hyperparameters (CAN.__init__ defaults, small length) -----------
LENGTH = 16                      # network is LENGTH x LENGTH neurons
N_AXES = 2
A = 1.0
LAMBDA_NET = 13.0
BETA = 3.0 / LAMBDA_NET ** 2
GAMMA = 1.2 * BETA
L_SHIFT = 2.0
ALPHA = 0.10315
ENVELOPE_SCALE = 4.0
TAU = 0.01
N = LENGTH * LENGTH              # 256 neurons

BATCH_BLOCK = 128                # trajectories per grid block (fills v5e MXU rows)
TIME_CHUNK = 16                  # Euler steps per grid step (bounds velocity VMEM)
UNROLL = 8                       # partial unroll of the in-chunk step loop


# ---------------------------- Pallas kernel ---------------------------------
def _can_rollout_kernel(vel_ref, w_t_ref, s0_ref, env_ref, out_ref,
                        *, t_chunk, k_step, unroll):
    """One (batch block) x (time chunk) of the fused Euler rollout.

    vel_ref: (t_chunk, Bb, 2) VMEM f32   velocities for this time chunk
    w_t_ref: (N, N)           VMEM bf16  weights^T (resident across the grid)
    s0_ref:  (Bb, N)          VMEM f32   initial state (used only at chunk 0)
    env_ref: (3, N)           VMEM f32   rows = [alpha*env*dx, alpha*env*dy, env]
    out_ref: (Bb, N)          VMEM f32   state; resident across the time axis
    """
    # Initialize the resident state block from the initial state at chunk 0.
    @pl.when(pl.program_id(1) == 0)
    def _():
        out_ref[...] = s0_ref[...]

    # Hoist loop-invariant row loads out of the step body.
    ed_x = env_ref[0:1, :]            # (1, N)  alpha * envelope * directions[:, 0]
    ed_y = env_ref[1:2, :]            # (1, N)  alpha * envelope * directions[:, 1]
    env = env_ref[2:3, :]             # (1, N)  envelope

    def step(t, s):
        v = vel_ref[t]                                   # (Bb, 2)
        vx = v[:, 0:1]                                   # (Bb, 1)
        vy = v[:, 1:2]                                   # (Bb, 1)
        # b = envelope * (1 + alpha * directions @ v), pre-folded form.
        b = env + vx * ed_x + vy * ed_y                  # (Bb, N)
        # weights @ state == state_row @ weights^T  (bf16 MXU, f32 accumulate).
        ws = jnp.dot(s.astype(jnp.bfloat16), w_t_ref[...],
                     preferred_element_type=jnp.float32)
        act = jnp.maximum(ws + b, 0.0)                   # ReLU
        return s + k_step * (act - s)                    # Euler step, K = dt/tau

    out_ref[...] = lax.fori_loop(0, t_chunk, step, out_ref[...], unroll=unroll)


def build_can_rollout(n_steps, batch_total, step_size,
                      *, batch_block=BATCH_BLOCK, time_chunk=TIME_CHUNK):
    """Returns a jitted callable running n_steps fused Euler steps for
    batch_total independent CAN trajectories."""
    assert batch_total % batch_block == 0
    t_chunk = min(time_chunk, n_steps)
    assert n_steps % t_chunk == 0
    n_bblocks = batch_total // batch_block
    n_tchunks = n_steps // t_chunk
    k_step = step_size / TAU
    unroll = max(1, min(UNROLL, t_chunk))

    kernel = functools.partial(_can_rollout_kernel,
                               t_chunk=t_chunk, k_step=k_step, unroll=unroll)

    flops = 2 * n_steps * batch_total * N * N + 6 * n_steps * batch_total * N
    bytes_accessed = (n_steps * batch_total * 2 * 4      # velocities
                      + N * N * 2                         # weights^T (bf16)
                      + 2 * batch_total * N * 4           # state in/out
                      + 3 * N * 4)                        # envelope pack

    call = pl.pallas_call(
        kernel,
        out_shape=jax.ShapeDtypeStruct((batch_total, N), jnp.float32),
        grid=(n_bblocks, n_tchunks),
        in_specs=[
            # velocities: time-chunked + batch-blocked, pipelined behind compute
            pl.BlockSpec((t_chunk, batch_block, 2), lambda i, t: (t, i, 0)),
            # weights^T bf16: constant block index -> DMA'd once, VMEM resident
            pl.BlockSpec((N, N), lambda i, t: (0, 0)),
            # initial state for this batch block
            pl.BlockSpec((batch_block, N), lambda i, t: (i, 0)),
            # [alpha*env*dx, alpha*env*dy, env]
            pl.BlockSpec((3, N), lambda i, t: (0, 0)),
        ],
        # State block is resident across the time-chunk axis (accumulator pattern).
        out_specs=pl.BlockSpec((batch_block, N), lambda i, t: (i, 0)),
        compiler_params=pltpu.CompilerParams(
            dimension_semantics=("parallel", "arbitrary"),
            vmem_limit_bytes=32 * 1024 * 1024),
        cost_estimate=pl.CostEstimate(flops=flops, transcendentals=0,
                                      bytes_accessed=bytes_accessed),
    )
    return jax.jit(call)


# --------------------- deterministic parameter construction -----------------
def build_can_params(key, batch_total):
    """Recreates CAN.__init__ buffers (directions, weights, envelope, states)."""
    n_directions = N_AXES ** 2
    angles = [2.0 * i * math.pi / n_directions for i in range(n_directions)]
    directions = jnp.array(
        [[math.cos(a), math.sin(a)] for a in angles], dtype=jnp.float32
    )
    directions = jnp.round(directions * 10000.0) / 10000.0
    n_repeats = LENGTH ** 2 // N_AXES ** 2
    directions = jnp.tile(directions, (n_repeats, 1))            # (N, 2)

    half = LENGTH // 2
    coords = jnp.arange(-half, half, dtype=jnp.float32)
    gx, gy = jnp.meshgrid(coords, coords, indexing="ij")
    neuron_grid = jnp.stack([gx, gy], axis=-1).reshape(-1, 2)    # (N, 2)

    # weights = center_surround(cdist(grid, grid + l*directions)**2)
    shifted = neuron_grid + L_SHIFT * directions                 # (N, 2)
    diff = neuron_grid[:, None, :] - shifted[None, :, :]         # (N, N, 2)
    d2 = jnp.sum(diff ** 2, axis=-1)                             # (N, N)
    weights = A * jnp.exp(-GAMMA * d2) - jnp.exp(-BETA * d2)     # (N, N)

    # envelope (delta_r defaults to length)
    delta_r = float(LENGTH)
    grid_mag = jnp.linalg.norm(neuron_grid, axis=-1)
    length_ratio = jnp.maximum(grid_mag - LENGTH + delta_r, 0.0) / delta_r
    envelope = jnp.exp(-ENVELOPE_SCALE * length_ratio ** 2)      # (N,)

    # batch_total independent instances: state ~ randn(N) / length**2
    state0 = jax.random.normal(key, (batch_total, N), dtype=jnp.float32) / LENGTH ** 2
    return weights, directions, envelope, state0


# -------------------------- plain-JAX reference ------------------------------
def reference_rollout(velocities, weights, directions, envelope, state0, step_size,
                      matmul_dtype=jnp.float32):
    """n_steps module-forward calls (warmup branch), batched.

    matmul_dtype=float32    -> ground-truth f32 reference.
    matmul_dtype=bfloat16   -> matches the kernel's bf16-MXU matmul numerics.
    """
    k = step_size / TAU
    hi = lax.Precision.HIGHEST
    w_t = weights.T.astype(matmul_dtype)

    def step(s, v):
        b = (1.0 + ALPHA * jnp.einsum("bj,nj->bn", v, directions,
                                      precision=hi)) * envelope
        ws = jnp.dot(s.astype(matmul_dtype), w_t,
                     preferred_element_type=jnp.float32, precision=hi)
        act = jnp.maximum(ws + b, 0.0)
        return s + k * (act - s), None

    s_final, _ = lax.scan(step, state0, velocities)
    return s_final


# ---------------------------------- main -------------------------------------
if __name__ == "__main__":
    key = jax.random.PRNGKey(0)
    k_state, k_vel1, k_vel2, k_vel3 = jax.random.split(key, 4)

    B_TOTAL = 2 * BATCH_BLOCK    # 256 trajectories -> 2 "parallel" grid blocks
    weights, directions, envelope, state0 = build_can_params(k_state, B_TOTAL)

    # One-time parameter preprocessing ("glue") passed to the kernel:
    weights_t_bf16 = weights.T.astype(jnp.bfloat16)              # (N, N) bf16
    env_pack = jnp.concatenate(
        [(ALPHA * envelope)[None, :] * directions.T,             # (2, N)
         envelope[None, :]], axis=0)                             # (3, N) f32

    # --- Check 1: single step at the module's default step_size = 0.5 --------
    vel_1 = jax.random.normal(k_vel1, (1, B_TOTAL, 2), dtype=jnp.float32)
    out_1 = build_can_rollout(1, B_TOTAL, 0.5)(
        vel_1, weights_t_bf16, state0, env_pack)
    jax.block_until_ready(out_1)
    ref_1 = reference_rollout(vel_1, weights, directions, envelope, state0, 0.5)
    assert jnp.allclose(out_1, ref_1, atol=1e-1, rtol=1e-2), "single-step mismatch"

    # --- Check 2: fused 8-step rollout (one time chunk), small Euler step -----
    T2 = 8
    vel_2 = jax.random.normal(k_vel2, (T2, B_TOTAL, 2), dtype=jnp.float32)
    out_2 = build_can_rollout(T2, B_TOTAL, 0.001)(
        vel_2, weights_t_bf16, state0, env_pack)
    jax.block_until_ready(out_2)
    ref_2 = reference_rollout(vel_2, weights, directions, envelope, state0, 0.001)
    assert jnp.allclose(out_2, ref_2, atol=5e-2, rtol=5e-2), "fused rollout mismatch"

    # --- Check 3: 32 steps = 2 time chunks -> exercises the resident-state ----
    #     carry across the "arbitrary" time-chunk grid axis.  Compared against a
    #     bf16-matmul-matched reference so the check isolates chunking/carry
    #     correctness from bf16 drift.
    T3 = 32
    vel_3 = jax.random.normal(k_vel3, (T3, B_TOTAL, 2), dtype=jnp.float32)
    out_3 = build_can_rollout(T3, B_TOTAL, 0.001)(
        vel_3, weights_t_bf16, state0, env_pack)
    jax.block_until_ready(out_3)
    ref_3 = reference_rollout(vel_3, weights, directions, envelope, state0, 0.001,
                              matmul_dtype=jnp.bfloat16)
    assert jnp.allclose(out_3, ref_3, atol=2e-3, rtol=2e-3), "chunked rollout mismatch"

    print("KERNEL_OK")
</pallas_src>

<mosaic_0001>
module attributes {stable_mosaic.version = 11 : i64} {
  func.func @_can_rollout_kernel(%arg0: i32, %arg1: i32, %arg2: memref<1x128x2xf32, #tpu.memory_space<vmem>>, %arg3: memref<256x256xbf16, #tpu.memory_space<vmem>>, %arg4: memref<128x256xf32, #tpu.memory_space<vmem>>, %arg5: memref<3x256xf32, #tpu.memory_space<vmem>>, %arg6: memref<128x256xf32, #tpu.memory_space<vmem>>) attributes {dimension_semantics = [#tpu.dimension_semantics<parallel>, #tpu.dimension_semantics<arbitrary>], iteration_bounds = array<i64: 2, 1>, scalar_prefetch = 0 : i64, scratch_operands = 0 : i64, tpu.core_type = #tpu.core_type<tc>, window_params = [{transform_indices = @transform_0, window_bounds = array<i64: 1, 128, 2>}, {pipeline_mode = #tpu.pipeline_mode<synchronous>, transform_indices = @transform_1, window_bounds = array<i64: 256, 256>}, {transform_indices = @transform_2, window_bounds = array<i64: 128, 256>}, {pipeline_mode = #tpu.pipeline_mode<synchronous>, transform_indices = @transform_3, window_bounds = array<i64: 3, 256>}, {transform_indices = @transform_4, window_bounds = array<i64: 128, 256>}]} {
    %c0_i32 = arith.constant 0 : i32
    %0 = arith.cmpi eq, %arg1, %c0_i32 : i32
    %1 = arith.extui %0 : i1 to i32
    %c0_i32_0 = arith.constant 0 : i32
    %2 = arith.cmpi ne, %1, %c0_i32_0 : i32
    scf.if %2 {
      %c0_15 = arith.constant 0 : index
      %c0_16 = arith.constant 0 : index
      %32 = vector.load %arg4[%c0_15, %c0_16] : memref<128x256xf32, #tpu.memory_space<vmem>>, vector<128x256xf32>
      %c0_17 = arith.constant 0 : index
      %c0_18 = arith.constant 0 : index
      %33 = vector.load %arg6[%c0_17, %c0_18] : memref<128x256xf32, #tpu.memory_space<vmem>>, vector<128x256xf32>
      tpu.vector_store %arg6[%c0_17, %c0_18], %32 {strides = array<i32>} : memref<128x256xf32, #tpu.memory_space<vmem>>, vector<128x256xf32>,
    } else {
    }
    %c0 = arith.constant 0 : index
    %c0_1 = arith.constant 0 : index
    %3 = vector.load %arg5[%c0, %c0_1] : memref<3x256xf32, #tpu.memory_space<vmem>>, vector<1x256xf32>
    %c1 = arith.constant 1 : index
    %c0_2 = arith.constant 0 : index
    %4 = vector.load %arg5[%c1, %c0_2] : memref<3x256xf32, #tpu.memory_space<vmem>>, vector<1x256xf32>
    %c2 = arith.constant 2 : index
    %c0_3 = arith.constant 0 : index
    %5 = vector.load %arg5[%c2, %c0_3] : memref<3x256xf32, #tpu.memory_space<vmem>>, vector<1x256xf32>
    %c0_4 = arith.constant 0 : index
    %c0_5 = arith.constant 0 : index
    %6 = vector.load %arg6[%c0_4, %c0_5] : memref<128x256xf32, #tpu.memory_space<vmem>>, vector<128x256xf32>
    %c0_i32_6 = arith.constant 0 : i32
    %7 = arith.index_cast %c0_i32_6 : i32 to index
    %c0_7 = arith.constant 0 : index
    %c0_8 = arith.constant 0 : index
    %8 = vector.load %arg2[%7, %c0_7, %c0_8] : memref<1x128x2xf32, #tpu.memory_space<vmem>>, vector<1x128x2xf32>
    %9 = vector.shape_cast %8 : vector<1x128x2xf32> to vector<128x2xf32>
    %10 = vector.extract_strided_slice %9 {offsets = [0, 0], sizes = [128, 1], strides = [1, 1]} : vector<128x2xf32> to vector<128x1xf32>
    %11 = vector.extract_strided_slice %9 {offsets = [0, 1], sizes = [128, 1], strides = [1, 1]} : vector<128x2xf32> to vector<128x1xf32>
    %12 = vector.broadcast %10 : vector<128x1xf32> to vector<128x256xf32>
    %13 = vector.broadcast %3 : vector<1x256xf32> to vector<128x256xf32>
    %14 = arith.mulf %12, %13 : vector<128x256xf32>
    %15 = vector.broadcast %5 : vector<1x256xf32> to vector<128x256xf32>
    %16 = arith.addf %15, %14 : vector<128x256xf32>
    %17 = vector.broadcast %11 : vector<128x1xf32> to vector<128x256xf32>
    %18 = vector.broadcast %4 : vector<1x256xf32> to vector<128x256xf32>
    %19 = arith.mulf %17, %18 : vector<128x256xf32>
    %20 = arith.addf %16, %19 : vector<128x256xf32>
    %21 = arith.truncf %6 : vector<128x256xf32> to vector<128x256xbf16>
    %c0_9 = arith.constant 0 : index
    %c0_10 = arith.constant 0 : index
    %22 = vector.load %arg3[%c0_9, %c0_10] : memref<256x256xbf16, #tpu.memory_space<vmem>>, vector<256x256xbf16>
    %cst = arith.constant dense<0.000000e+00> : vector<128x256xf32>
    %23 = tpu.matmul %21, %22, %cst {dimension_numbers = #tpu.dot_dimension_numbers<[1], [0], [0], [1], [0, 0, 1, 1], [], []>} : vector<128x256xbf16>, vector<256x256xbf16>, vector<128x256xf32> -> vector<128x256xf32>
    %24 = arith.addf %23, %20 : vector<128x256xf32>
    %cst_11 = arith.constant 0.000000e+00 : f32
    %25 = vector.broadcast %cst_11 : f32 to vector<128x256xf32>
    %26 = arith.maximumf %24, %25 : vector<128x256xf32>
    %27 = arith.subf %26, %6 : vector<128x256xf32>
    %cst_12 = arith.constant 5.000000e+01 : f32
    %28 = vector.broadcast %cst_12 : f32 to vector<128x256xf32>
    %29 = arith.mulf %28, %27 : vector<128x256xf32>
    %30 = arith.addf %6, %29 : vector<128x256xf32>
    %c1_i32 = arith.constant 1 : i32
    %c0_13 = arith.constant 0 : index
    %c0_14 = arith.constant 0 : index
    %31 = vector.load %arg6[%c0_13, %c0_14] : memref<128x256xf32, #tpu.memory_space<vmem>>, vector<128x256xf32>
    tpu.vector_store %arg6[%c0_13, %c0_14], %30 {strides = array<i32>} : memref<128x256xf32, #tpu.memory_space<vmem>>, vector<128x256xf32>,
    return
  }
  func.func @transform_0(%arg0: i32, %arg1: i32) -> (i32, i32, i32) {
    %c0_i32 = arith.constant 0 : i32
    %c0_i32_0 = arith.constant 0 : i32
    return %arg1, %arg0, %c0_i32 : i32, i32, i32
  }
  func.func @transform_1(%arg0: i32, %arg1: i32) -> (i32, i32) {
    %c0_i32 = arith.constant 0 : i32
    %c0_i32_0 = arith.constant 0 : i32
    %c0_i32_1 = arith.constant 0 : i32
    return %c0_i32, %c0_i32_0 : i32, i32
  }
  func.func @transform_2(%arg0: i32, %arg1: i32) -> (i32, i32) {
    %c0_i32 = arith.constant 0 : i32
    %c0_i32_0 = arith.constant 0 : i32
    return %arg0, %c0_i32 : i32, i32
  }
  func.func @transform_3(%arg0: i32, %arg1: i32) -> (i32, i32) {
    %c0_i32 = arith.constant 0 : i32
    %c0_i32_0 = arith.constant 0 : i32
    %c0_i32_1 = arith.constant 0 : i32
    return %c0_i32, %c0_i32_0 : i32, i32
  }
  func.func @transform_4(%arg0: i32, %arg1: i32) -> (i32, i32) {
    %c0_i32 = arith.constant 0 : i32
    %c0_i32_0 = arith.constant 0 : i32
    return %arg0, %c0_i32 : i32, i32
  }
}

</mosaic_0001>

<bundles_post_ra>
// kernel: tpu_custom_call.1
= control target key start
LH: loop header
LB: loop body
LE: loop exit
PB: predicated region body
PF: predicated region fallthrough
CT: control target
= control target key end

     0   :  { %9 = vsyncpa [#allocation3], 0  ;;  %s2590_s0 = inlined_call_operand.vmem [shape: f32[1,256,2], index: 0, kind: input, shape index: {}]   ;;  %s2591_s1 = inlined_call_operand.vmem [shape: bf16[256,256], index: 1, kind: input, shape index: {}]   ;;  %s2592_s2 = inlined_call_operand.hbm [shape: f32[256,256], index: 2, kind: input, shape index: {}]   ;;  %s2593_s3 = inlined_call_operand.vmem [shape: f32[3,256], index: 3, kind: input, shape index: {}]   ;;  %s2594_s4 = inlined_call_operand.hbm [shape: f32[256,256], index: 4, kind: output, shape index: {}]  }
   0x1   :  { %11 = vsyncpa [#allocation3 + $0x1], 0 }
   0x2   :  { %12 = vsyncpa [#allocation4], 0 }
   0x3   :  { %14 = vsyncpa [#allocation4 + $0x1], 0  ;;  %s1644_s15 = smov 0   ;;  %s1646_s16 = smov 0  }
   0x4   :  { %s1648_s17 = smov 0   ;;  %s1650_s18 = smov 0  }
   0x5   :  { %s1652_s19 = smov 0   ;;  %s1654_s20 = smov 0  }
   0x6 LB: > { %s1288_s21 = sadd.s32 4294967295, %s1609_s20   ;;  %s1289_s22 = sadd.s32 4294967294, %s1609_s20   ;;  %s1609_s20 = sphi %s1654_s20, %s20_s20   ;;  %s1605_s19 = sphi %s1652_s19, %s2733_s19   ;;  %s1601_s18 = sphi %s1650_s18, %s2732_s18   ;;  %s1597_s17 = sphi %s1648_s17, %s2731_s17   ;;  %s1593_s16 = sphi %s1646_s16, %s2730_s16   ;;  %s1589_s15 = sphi %s1644_s15, %s2729_s15  }
   0x7   : > { %s32_s23 = sadd.s32 1, %s1605_s19  ;;  %s88_s24 = sadd.s32 1, %s1597_s17 }
   0x8   : > { %p34_p0 = scmp.ge.s32.totalorder %s32_s23, 2  ;;  %p95_p1 = scmp.ne.s32.totalorder %s1597_s17, %s1593_s16 }
   0x9   : > { %p96_p2 = scmp.eq.s32.totalorder %s1609_s20, 0  ;;  %p101_p3 = scmp.ne.s32.totalorder %s1593_s16, %s1589_s15 }
   0xa   : > { %s2735_s23 = smov (%p34_p0, %s32_s23), 0  ;;  %p102_p5 = scmp.eq.s32.totalorder %s1288_s21, 0 }
   0xb   : > { %p1685_p4 = por %p96_p2, %p95_p1  ;;  %s85_s26 = ssub.s32 %s1605_s19, %s2735_s23 }
   0xc   : > { %p146_p6 = scmp.eq.s32.totalorder %s1288_s21, 1  ;;  %p86_p7 = scmp.eq.s32.totalorder %s85_s26, 0 }
   0xd   : > { %p1691_p8 = por %p102_p5, %p101_p3  ;;  %p152_p10 = scmp.eq.s32.totalorder %s1289_s22, 1 }
   0xe   : > { %p1695_p9 = por %p146_p6, %p95_p1  ;;  %p1389_p13 = scmp.lt.s32.totalorder %s1609_s20, 2 }
   0xf   : > { %s1700_s29 = scalar_select %p86_p7, %s1597_s17, %s88_s24  }
  0x10   : > { %s2660_s28 = scalar_select %p1695_p9, 1, 0 }
  0x11   : > { %p1702_p11 = por %p152_p10, %p101_p3  ;;  %s191_s5 = sand.u32 1, %s1597_s17  }
  0x12   : > { %s1292_s6 = sshll.u32 %s191_s5, 8  ;;  %s1342_s7 = sshll.u32 %s1605_s19, 12 }
  0x13   : > { %s2661_s30 = scalar_select %p1702_p11, 1, 0 }
  0x14   : > { %s1713_s10 = scalar_lea.hbm %s2592_s2, %s1342_s7  ;;  %s195_s11 = scalar_lea.vmem [#allocation2], %s1292_s6 }
  0x15   : > { %s203_s12 = sshll.u32 %s195_s11, 4  ;;  %p1719_p0 = pnand %p1389_p13, %p1685_p4  ;;  %s1715_s12 = int_to_ptr.vmem [resolvable:$true] %s203_s12 }
  0x16   : > { %s1724_s14 = scalar_lea.sflag [#allocation3], %s191_s5  ;;  %s1497_s21 = scalar_lea.hbm %s1713_s10, 4096 }
  0x17   : > { %p1498_p2 = scmp.ne.s32.totalorder %s1713_s10, %s1497_s21  ;;  %p1499_p3 = pneg %p1719_p0 }
  0x18   : > { %s1502_s25 = scalar_lea.hbm %s2592_s2, 8192  ;;  %p1503_p4 = scmp.lt.u32.totalorder %s1713_s10, %s2592_s2 }
  0x19   : > { %p1500_p5 = pnand %p1499_p3, %p1498_p2  ;;  %p1504_p7 = scmp.lt.u32.totalorder %s1502_s25, %s1497_s21 }
  0x1a   : > { %p1506_p13 = scmp.lt.u32.totalorder %s1497_s21, %s1713_s10 }
  0x1b   : > { %p1501_p6 = pneg %p1500_p5  ;;  %p1505_p10 = por %p1504_p7, %p1503_p4 }
  0x1d   : > { %p1507_p12 = por %p1506_p13, %p1505_p10 }
  0x1f   : > { %p1508_p1 = pnand %p1507_p12, %p1501_p6 }
  0x21   : > { %1511 = shalt.err (!%p1508_p1)
}
  0x22   : > { %s1512_s5 = scalar_lea.vmem %s1715_s12, 4096  ;;  %s1611_s7 = smov [#allocation2]  }
  0x23   : > { %p1513_p2 = scmp.ne.s32.totalorder %s1715_s12, %s1512_s5  ;;  %s1517_s8 = sshll.u32 %s1611_s7, 4  ;;  %s1518_s8 = int_to_ptr.vmem [resolvable:$false] %s1517_s8 }
  0x24   : > { %s1519_s9 = scalar_lea.vmem %s1518_s8, 8192  ;;  %p1520_p9 = scmp.lt.s32.totalorder %s1715_s12, %s1518_s8 }
  0x25   : > { %p1515_p5 = pnand %p1513_p2, %p1499_p3  ;;  %p1521_p4 = scmp.lt.s32.totalorder %s1519_s9, %s1512_s5 }
  0x27   : > { %p1516_p11 = pneg %p1515_p5  ;;  %p1522_p7 = por %p1521_p4, %p1520_p9 }
  0x29   : > { %p1523_p10 = pnand %p1522_p7, %p1516_p11 }
  0x2b   : > { %1526 = shalt.err (!%p1523_p10)
}
  0x2c   : > { %s1612_s11 = smov 256   ;;  %s1613_s21 = smov 16  }
  0x2d   : > { %1384 = dma.hbm_to_vmem [thread:$0]  (!%p1719_p0), %s1713_s10, 4096, %s1715_s12, %s1724_s14, %s1612_s11, %s1612_s11, %s1613_s21  }
  0x2e   : > { %p211_p12 = scmp.lt.s32.totalorder %s1609_s20, 3  ;;  %p2663_p1 = scmp.ge.s32.totalorder %s1609_s20, 1 }
  0x30   : > { %p212_p3 = pnand %p2663_p1, %p211_p12 }
  0x32   : > { %215 = sbr.rel (%p212_p3) target bundleno = 398 (0x18e), region = 36 }
  0x39   : > { %s1756_s22 = sand.u32 1, %s1593_s16  }
  0x3a   : > { %s1297_s24 = sshll.u32 %s1756_s22, 8  ;;  %s218_s25 = scalar_lea.sflag [#allocation3], %s1756_s22 }
  0x3b   : > { %s1762_s26 = scalar_lea.vmem [#allocation2], %s1297_s24 }
  0x3c   : > { %1580 = dma.done.wait (%p1691_p8), %s218_s25, 4096  }
  0x3d   : > { %1582 = vsyncadd (%p1691_p8), %s218_s25, 4294963200  ;;  %v1614_v0 = vmov 0   ;;  %v1449_v1 = vld [vmem:[%s2591_s1 + $0x4] ss:$8 sps:$4 sm:$0xff]   ;;  %s1299_s13 = sshll.u32 %s1601_s18, 4  ;;  %v1842_v22 = vld [vmem:[%s1762_s26 + $0x8] sm:$0xff] }
  0x3e   : > { %1446 = vset.pattern.permute.xlu1 %v1614_v0  ;;  %1445 = vset.pattern.permute.xlu0 %v1614_v0  ;;  %v1451_v2 = vld [vmem:[%s2591_s1] ss:$8 sps:$4 sm:$0xff]   ;;  %v1452_v3 = vld [vmem:[%s2591_s1 + $0x14] ss:$8 sps:$4 sm:$0xff]   ;;  %v1454_v4 = vld [vmem:[%s2591_s1 + $0x10] ss:$8 sps:$4 sm:$0xff]  }
  0x3f   : > { %901 = vmatprep.subr.bf16.mxu0 %v1449_v1  ;;  %1345 = vmatprep.subr.bf16.mxu1 %v1449_v1  ;;  %p258_p8 = scmp.lt.s32.totalorder %s1299_s13, 31  ;;  %v1455_v5 = vld [vmem:[%s2591_s1 + $0x24] ss:$8 sps:$4 sm:$0xff]   ;;  %v1457_v6 = vld [vmem:[%s2591_s1 + $0x20] ss:$8 sps:$4 sm:$0xff]   ;;  %2664 = vst [vmem:[#allocation8_spill] sm:$0xff] %v1842_v22 }
  0x40   : > { %902 = vmatpush1.bf16.msra.mxu0 %v1451_v2  ;;  %1361 = vmatpush1.bf16.msra.mxu1 %v1451_v2  ;;  %v1458_v7 = vld [vmem:[%s2591_s1 + $0x34] ss:$8 sps:$4 sm:$0xff]   ;;  %v1460_v8 = vld [vmem:[%s2591_s1 + $0x30] ss:$8 sps:$4 sm:$0xff]   ;;  %v1461_v9 = vld [vmem:[%s2591_s1 + $0x44] ss:$8 sps:$4 sm:$0xff]  }
  0x41   : > { %903 = vmatprep.subr.bf16.mxu0 %v1452_v3  ;;  %1346 = vmatprep.subr.bf16.mxu1 %v1452_v3  ;;  %s2737_s13 = smov (!%p258_p8, %s1299_s13), 31  ;;  %v1463_v10 = vld [vmem:[%s2591_s1 + $0x40] ss:$8 sps:$4 sm:$0xff]   ;;  %v1464_v11 = vld [vmem:[%s2591_s1 + $0x54] ss:$8 sps:$4 sm:$0xff]   ;;  %v1615_v50 = vmov 1  }
  0x42   : > { %s1300_s5 = sshll.u32 %s2737_s13, 3  ;;  %v1466_v14 = vld [vmem:[%s2591_s1 + $0x50] ss:$8 sps:$4 sm:$0xff]   ;;  %v1467_v17 = vld [vmem:[%s2591_s1 + $0x64] ss:$8 sps:$4 sm:$0xff]   ;;  %s2424_s25 = scalar_lea.vmem [#allocation5], %s1297_s24 }
  0x43   : > { %s1799_s11 = scalar_lea.vmem %s2590_s0, %s1300_s5  ;;  %v1469_v18 = vld [vmem:[%s2591_s1 + $0x60] ss:$8 sps:$4 sm:$0xff]   ;;  %v1470_v19 = vld [vmem:[%s2591_s1 + $0x74] ss:$8 sps:$4 sm:$0xff]   ;;  %v1472_v28 = vld [vmem:[%s2591_s1 + $0x70] ss:$8 sps:$4 sm:$0xff]  }
  0x44   : > { %904 = vmatpush1.bf16.msra.mxu0 %v1454_v4  ;;  %1362 = vmatpush1.bf16.msra.mxu1 %v1454_v4  ;;  %v1808_v12 = vld [vmem:[%s1799_s11 + $0x10] sm:$0xff]  ;;  %v1811_v13 = vld [vmem:[%s1799_s11] sm:$0xff]  ;;  %v1819_v15 = vld [vmem:[%s1799_s11 + $0x18] sm:$0xff]  ;;  %s1344_s24 = sshll.u32 %s1601_s18, 12  ;;  %s1189_s13 = sshll.u32 %s2424_s25, 4  ;;  %s2533_s13 = int_to_ptr.vmem [resolvable:$true] %s1189_s13 }
  0x45   : > { %905 = vmatprep.subr.bf16.mxu0 %v1455_v5  ;;  %1347 = vmatprep.subr.bf16.mxu1 %v1455_v5  ;;  %v1822_v16 = vld [vmem:[%s1799_s11 + $0x8] sm:$0xff]  ;;  %v1839_v21 = vld [vmem:[%s1799_s11 + $0x20] sm:$0xff]  ;;  %v1848_v24 = vld [vmem:[%s1762_s26 + $0x88] sm:$0xff]  ;;  %s2531_s12 = scalar_lea.hbm %s2594_s4, %s1344_s24  ;;  %s1175_s14 = scalar_lea.sflag [#allocation4], %s1756_s22 }
  0x46   : > { %400 = vperm.xlu1 %1446, %v1808_v12   ;;  %390 = vperm.xlu0 %1445, %v1811_v13   ;;  %v1836_v20 = vld [vmem:[%s1799_s11 + $0x28] sm:$0xff]  ;;  %v1845_v23 = vld [vmem:[%s1762_s26 + $0x18] sm:$0xff]  ;;  %2666 = vst [vmem:[#allocation10_spill] sm:$0xff] %v1848_v24  ;;  %v1863_v29 = vld [vmem:[%s1799_s11 + $0x38] sm:$0xff]  ;;  %s1527_s6 = scalar_lea.vmem %s2533_s13, 4096  ;;  %p2726_p11 = scmp.ne.s32.totalorder %s2660_s28, 0 }
  0x47   : > { %2665 = vst [vmem:[#allocation9_spill] sm:$0xff] %v1845_v23  ;;  %v694_v25 = vpack.c.bf16 %v1845_v23, %v1842_v22  ;;  %v1853_v26 = vld [vmem:[%s1762_s26 + $0x98] sm:$0xff]  ;;  %v1866_v30 = vld [vmem:[%s1799_s11 + $0x30] sm:$0xff]  ;;  %v1877_v33 = vld [vmem:[%s1799_s11 + $0x48] sm:$0xff]  ;;  %p1528_p9 = scmp.ne.s32.totalorder %s2533_s13, %s1527_s6  ;;  %s1616_s5 = smov [#allocation5]  }
  0x48   : > { %906 = vmatpush1.bf16.msra.mxu0 %v1457_v6  ;;  %1363 = vmatpush1.bf16.msra.mxu1 %v1457_v6  ;;  %2667 = vst [vmem:[#allocation11_spill] sm:$0xff] %v1853_v26  ;;  %v702_v27 = vpack.c.bf16 %v1853_v26, %v1848_v24  ;;  %v1473_v31 = vld [vmem:[%s2591_s1 + $0x84] ss:$8 sps:$4 sm:$0xff]   ;;  %v1475_v32 = vld [vmem:[%s2591_s1 + $0x80] ss:$8 sps:$4 sm:$0xff]   ;;  %v1891_v37 = vld [vmem:[%s1799_s11 + $0x58] sm:$0xff] }
  0x49   : > { %907 = vmatprep.subr.bf16.mxu0 %v1458_v7  ;;  %1348 = vmatprep.subr.bf16.mxu1 %v1458_v7  ;;  %v1880_v34 = vld [vmem:[%s1799_s11 + $0x40] sm:$0xff]  ;;  %v1476_v35 = vld [vmem:[%s2591_s1 + $0x94] ss:$8 sps:$4 sm:$0xff]   ;;  %v1478_v36 = vld [vmem:[%s2591_s1 + $0x90] ss:$8 sps:$4 sm:$0xff]   ;;  %p1529_p0 = pnand %p1528_p9, %p2726_p11  ;;  %s1531_s7 = sshll.u32 %s1616_s5, 4  ;;  %s1532_s7 = int_to_ptr.vmem [resolvable:$false] %s1531_s7 }
  0x4a   : > { %405 = vperm.xlu1 %1446, %v1819_v15   ;;  %395 = vperm.xlu0 %1445, %v1822_v16   ;;  %v1894_v38 = vld [vmem:[%s1799_s11 + $0x50] sm:$0xff]  ;;  %v1479_v39 = vld [vmem:[%s2591_s1 + $0xa4] ss:$8 sps:$4 sm:$0xff]   ;;  %v1481_v40 = vld [vmem:[%s2591_s1 + $0xa0] ss:$8 sps:$4 sm:$0xff]   ;;  %p1534_p13 = scmp.lt.s32.totalorder %s2533_s13, %s1532_s7 }
  0x4b   : > { %933 = vmatprep.mubr.bf16.mxu0 %v694_v25  ;;  %973 = vmatprep.mubr.bf16.mxu1 %v702_v27  ;;  %v1905_v41 = vld [vmem:[%s1799_s11 + $0x68] sm:$0xff]  ;;  %v1908_v42 = vld [vmem:[%s1799_s11 + $0x60] sm:$0xff]  ;;  %v1482_v43 = vld [vmem:[%s2591_s1 + $0xb4] ss:$8 sps:$4 sm:$0xff]   ;;  %p1530_p6 = pneg %p1529_p0 }
  0x4c   : > { %908 = vmatpush1.bf16.msra.mxu0 %v1460_v8  ;;  %1364 = vmatpush1.bf16.msra.mxu1 %v1460_v8  ;;  %v1484_v44 = vld [vmem:[%s2591_s1 + $0xb0] ss:$8 sps:$4 sm:$0xff]   ;;  %v1485_v47 = vld [vmem:[%s2591_s1 + $0xc4] ss:$8 sps:$4 sm:$0xff]   ;;  %v1487_v48 = vld [vmem:[%s2591_s1 + $0xc0] ss:$8 sps:$4 sm:$0xff]  }
  0x4d   : > { %909 = vmatprep.subr.bf16.mxu0 %v1461_v9  ;;  %1349 = vmatprep.subr.bf16.mxu1 %v1461_v9  ;;  %v1919_v45 = vld [vmem:[%s1799_s11 + $0x78] sm:$0xff]  ;;  %v1922_v46 = vld [vmem:[%s1799_s11 + $0x70] sm:$0xff]  ;;  %v1491_v52 = vld [vmem:[%s2591_s1 + $0xe4] ss:$8 sps:$4 sm:$0xff]  }
  0x4e   : > { %415 = vperm.xlu1 %1446, %v1836_v20   ;;  %410 = vperm.xlu0 %1445, %v1839_v21   ;;  %v1488_v49 = vld [vmem:[%s2591_s1 + $0xd4] ss:$8 sps:$4 sm:$0xff]   ;;  %v1490_v51 = vld [vmem:[%s2591_s1 + $0xd0] ss:$8 sps:$4 sm:$0xff]   ;;  %v1493_v53 = vld [vmem:[%s2591_s1 + $0xe0] ss:$8 sps:$4 sm:$0xff]  }
  0x4f   : > { %v1494_v54 = vld [vmem:[%s2591_s1 + $0xf4] ss:$8 sps:$4 sm:$0xff]   ;;  %v1496_v55 = vld [vmem:[%s2591_s1 + $0xf0] ss:$8 sps:$4 sm:$0xff]   ;;  %v1955_v56 = vld [vmem:[%s1762_s26] sm:$0xff] }
  0x50   : > { %910 = vmatpush1.bf16.msra.mxu0 %v1463_v10  ;;  %1365 = vmatpush1.bf16.msra.mxu1 %v1463_v10  ;;  %v1958_v57 = vld [vmem:[%s1762_s26 + $0x10] sm:$0xff]  ;;  %v1961_v58 = vld [vmem:[%s1762_s26 + $0x80] sm:$0xff]  ;;  %v1967_v60 = vld [vmem:[%s1762_s26 + $0x28] sm:$0xff] }
  0x51   : > { %911 = vmatprep.subr.bf16.mxu0 %v1464_v11  ;;  %1350 = vmatprep.subr.bf16.mxu1 %v1464_v11  ;;  %2668 = vst [vmem:[#allocation12_spill] sm:$0xff] %v1958_v57  ;;  %2669 = vst [vmem:[#allocation13_spill] sm:$0xff] %v1961_v58  ;;  %v1964_v59 = vld [vmem:[%s1762_s26 + $0x90] sm:$0xff]  ;;  %v1970_v61 = vld [vmem:[%s1762_s26 + $0x38] sm:$0xff]  ;;  %v693_v0 = vpack.c.bf16 %v1958_v57, %v1955_v56 }
  0x52   : > { %425 = vperm.xlu1 %1446, %v1863_v29   ;;  %420 = vperm.xlu0 %1445, %v1866_v30   ;;  %2670 = vst [vmem:[#allocation14_spill] sm:$0xff] %v1964_v59  ;;  %2671 = vst [vmem:[#allocation15_spill] sm:$0xff] %v1967_v60  ;;  %v1973_v62 = vld [vmem:[%s1762_s26 + $0xa8] sm:$0xff]  ;;  %v1976_v63 = vld [vmem:[%s1762_s26 + $0xb8] sm:$0xff]  ;;  %v701_v1 = vpack.c.bf16 %v1964_v59, %v1961_v58  ;;  %v696_v2 = vpack.c.bf16 %v1970_v61, %v1967_v60 }
  0x53   : > { %2672 = vst [vmem:[#allocation16_spill] sm:$0xff] %v1970_v61  ;;  %2673 = vst [vmem:[#allocation17_spill] sm:$0xff] %v1973_v62  ;;  %v704_v3 = vpack.c.bf16 %v1976_v63, %v1973_v62  ;;  %v1991_v4 = vld [vmem:[%s1762_s26 + $0x20] sm:$0xff]  ;;  %v1994_v5 = vld [vmem:[%s1762_s26 + $0x30] sm:$0xff] }
  0x54   : > { %912 = vmatpush1.bf16.msra.mxu0 %v1466_v14  ;;  %1366 = vmatpush1.bf16.msra.mxu1 %v1466_v14  ;;  %2674 = vst [vmem:[#allocation18_spill] sm:$0xff] %v1976_v63  ;;  %2675 = vst [vmem:[#allocation19_spill] sm:$0xff] %v1991_v4  ;;  %v1997_v6 = vld [vmem:[%s1762_s26 + $0xa0] sm:$0xff]  ;;  %v2000_v7 = vld [vmem:[%s1762_s26 + $0xb0] sm:$0xff] }
  0x55   : > { %913 = vmatprep.subr.bf16.mxu0 %v1467_v17  ;;  %1351 = vmatprep.subr.bf16.mxu1 %v1467_v17  ;;  %2676 = vst [vmem:[#allocation20_spill] sm:$0xff] %v1994_v5  ;;  %2677 = vst [vmem:[#allocation21_spill] sm:$0xff] %v1997_v6  ;;  %v2003_v8 = vld [vmem:[%s1762_s26 + $0x48] sm:$0xff]  ;;  %v2006_v9 = vld [vmem:[%s1762_s26 + $0x58] sm:$0xff] }
  0x56   : > { %435 = vperm.xlu1 %1446, %v1877_v33   ;;  %430 = vperm.xlu0 %1445, %v1880_v34   ;;  %2678 = vst [vmem:[#allocation22_spill] sm:$0xff] %v2000_v7  ;;  %2679 = vst [vmem:[#allocation23_spill] sm:$0xff] %v2003_v8  ;;  %v2009_v10 = vld [vmem:[%s1762_s26 + $0xc8] sm:$0xff]  ;;  %v2012_v11 = vld [vmem:[%s1762_s26 + $0xd8] sm:$0xff]  ;;  %v698_v14 = vpack.c.bf16 %v2006_v9, %v2003_v8 }
  0x57   : > { %2680 = vst [vmem:[#allocation24_spill] sm:$0xff] %v2006_v9  ;;  %2681 = vst [vmem:[#allocation25_spill] sm:$0xff] %v2009_v10  ;;  %v2030_v17 = vld [vmem:[%s1762_s26 + $0x50] sm:$0xff]  ;;  %v2045_v25 = vld [vmem:[%s1762_s26 + $0xe8] sm:$0xff] }
  0x58   : > { %914 = vmatpush1.bf16.msra.mxu0 %v1469_v18  ;;  %1367 = vmatpush1.bf16.msra.mxu1 %v1469_v18  ;;  %2682 = vst [vmem:[#allocation26_spill] sm:$0xff] %v2012_v11  ;;  %2684 = vst [vmem:[#allocation28_spill] sm:$0xff] %v2030_v17  ;;  %v2033_v18 = vld [vmem:[%s1762_s26 + $0xc0] sm:$0xff]  ;;  %v2048_v27 = vld [vmem:[%s1762_s26 + $0xf8] sm:$0xff] }
  0x59   : > { %915 = vmatprep.subr.bf16.mxu0 %v1470_v19  ;;  %1352 = vmatprep.subr.bf16.mxu1 %v1470_v19  ;;  %2685 = vst [vmem:[#allocation29_spill] sm:$0xff] %v2033_v18  ;;  %v2036_v19 = vld [vmem:[%s1762_s26 + $0xd0] sm:$0xff]  ;;  %2689 = vst [vmem:[#allocation33_spill] sm:$0xff] %v2045_v25 }
  0x5a   : > { %445 = vperm.xlu1 %1446, %v1891_v37   ;;  %440 = vperm.xlu0 %1445, %v1894_v38   ;;  %2686 = vst [vmem:[#allocation30_spill] sm:$0xff] %v2036_v19  ;;  %2690 = vst [vmem:[#allocation34_spill] sm:$0xff] %v2048_v27 }
  0x5c   : > { %916 = vmatpush1.bf16.msra.mxu0 %v1472_v28  ;;  %1368 = vmatpush1.bf16.msra.mxu1 %v1472_v28 }
  0x5d   : > { %917 = vmatprep.subr.bf16.mxu0 %v1473_v31  ;;  %1353 = vmatprep.subr.bf16.mxu1 %v1473_v31  ;;  %v708_v31 = vpack.c.bf16 %v2048_v27, %v2045_v25 }
  0x5e   : > { %455 = vperm.xlu1 %1446, %v1905_v41   ;;  %450 = vperm.xlu0 %1445, %v1908_v42  }
  0x60   : > { %918 = vmatpush1.bf16.msra.mxu0 %v1475_v32  ;;  %1369 = vmatpush1.bf16.msra.mxu1 %v1475_v32  ;;  %v2063_v32 = vld [vmem:[%s1762_s26 + $0x60] sm:$0xff] }
  0x61   : > { %919 = vmatprep.subr.bf16.mxu0 %v1476_v35  ;;  %1354 = vmatprep.subr.bf16.mxu1 %v1476_v35  ;;  %2691 = vst [vmem:[#allocation35_spill] sm:$0xff] %v2063_v32  ;;  %v2072_v35 = vld [vmem:[%s1762_s26 + $0xf0] sm:$0xff] }
  0x62   : > { %465 = vperm.xlu1 %1446, %v1919_v45   ;;  %460 = vperm.xlu0 %1445, %v1922_v46   ;;  %2694 = vst [vmem:[#allocation38_spill] sm:$0xff] %v2072_v35 }
  0x64   : > { %920 = vmatpush1.bf16.msra.mxu0 %v1478_v36  ;;  %1370 = vmatpush1.bf16.msra.mxu1 %v1478_v36 }
  0x65   : > { %921 = vmatprep.subr.bf16.mxu0 %v1479_v39  ;;  %1355 = vmatprep.subr.bf16.mxu1 %v1479_v39 }
  0x66   : > { %1448 = vset.pattern.permute.xlu1 %v1615_v50  ;;  %1447 = vset.pattern.permute.xlu0 %v1615_v50 }
  0x67   : > { %559 = vperm.xlu1 %1448, %v1822_v16   ;;  %555 = vperm.xlu0 %1447, %v1811_v13   ;;  %v703_v13 = vpack.c.bf16 %v2000_v7, %v1997_v6  ;;  %v2027_v16 = vld [vmem:[%s1762_s26 + $0x40] sm:$0xff] }
  0x68   : > { %922 = vmatpush1.bf16.msra.mxu0 %v1481_v40  ;;  %1371 = vmatpush1.bf16.msra.mxu1 %v1481_v40  ;;  %2683 = vst [vmem:[#allocation27_spill] sm:$0xff] %v2027_v16  ;;  %v697_v28 = vpack.c.bf16 %v2030_v17, %v2027_v16 }
  0x69   : > { %923 = vmatprep.subr.bf16.mxu0 %v1482_v43  ;;  %1356 = vmatprep.subr.bf16.mxu1 %v1482_v43 }
  0x6b   : > { %563 = vperm.xlu1 %1448, %v1808_v12   ;;  %567 = vperm.xlu0 %1447, %v1819_v15   ;;  %v695_v12 = vpack.c.bf16 %v1994_v5, %v1991_v4  ;;  %v706_v15 = vpack.c.bf16 %v2012_v11, %v2009_v10 }
  0x6c   : > { %924 = vmatpush1.bf16.msra.mxu0 %v1484_v44  ;;  %1372 = vmatpush1.bf16.msra.mxu1 %v1484_v44 }
  0x6d   : > { %925 = vmatprep.subr.bf16.mxu0 %v1485_v47  ;;  %1357 = vmatprep.subr.bf16.mxu1 %v1485_v47 }
  0x6f   : > { %571 = vperm.xlu1 %1448, %v1839_v21   ;;  %575 = vperm.xlu0 %1447, %v1836_v20   ;;  %v2039_v20 = vld [vmem:[%s1762_s26 + $0x68] sm:$0xff]  ;;  %v2042_v21 = vld [vmem:[%s1762_s26 + $0x78] sm:$0xff] }
  0x70   : > { %926 = vmatpush1.bf16.msra.mxu0 %v1487_v48  ;;  %1373 = vmatpush1.bf16.msra.mxu1 %v1487_v48  ;;  %2687 = vst [vmem:[#allocation31_spill] sm:$0xff] %v2039_v20  ;;  %2688 = vst [vmem:[#allocation32_spill] sm:$0xff] %v2042_v21 }
  0x71   : > { %927 = vmatprep.subr.bf16.mxu0 %v1488_v49  ;;  %1358 = vmatprep.subr.bf16.mxu1 %v1488_v49 }
  0x73   : > { %579 = vperm.xlu1 %1448, %v1866_v30   ;;  %583 = vperm.xlu0 %1447, %v1863_v29   ;;  %v705_v29 = vpack.c.bf16 %v2036_v19, %v2033_v18  ;;  %v700_v30 = vpack.c.bf16 %v2042_v21, %v2039_v20 }
  0x74   : > { %928 = vmatpush1.bf16.msra.mxu0 %v1490_v51  ;;  %1374 = vmatpush1.bf16.msra.mxu1 %v1490_v51 }
  0x75   : > { %929 = vmatprep.subr.bf16.mxu0 %v1491_v52  ;;  %1359 = vmatprep.subr.bf16.mxu1 %v1491_v52 }
  0x77   : > { %587 = vperm.xlu1 %1448, %v1880_v34   ;;  %591 = vperm.xlu0 %1447, %v1877_v33   ;;  %v2066_v33 = vld [vmem:[%s1762_s26 + $0x70] sm:$0xff]  ;;  %v2069_v34 = vld [vmem:[%s1762_s26 + $0xe0] sm:$0xff]  ;;  %s1533_s26 = scalar_lea.vmem %s1532_s7, 8192 }
  0x78   : > { %930 = vmatpush1.bf16.msra.mxu0 %v1493_v53  ;;  %1375 = vmatpush1.bf16.msra.mxu1 %v1493_v53  ;;  %2692 = vst [vmem:[#allocation36_spill] sm:$0xff] %v2066_v33  ;;  %2693 = vst [vmem:[#allocation37_spill] sm:$0xff] %v2069_v34  ;;  %v699_v36 = vpack.c.bf16 %v2066_v33, %v2063_v32  ;;  %p1535_p2 = scmp.lt.s32.totalorder %s1533_s26, %s1527_s6 }
  0x79   : > { %931 = vmatprep.subr.bf16.mxu0 %v1494_v54  ;;  %1360 = vmatprep.subr.bf16.mxu1 %v1494_v54 }
  0x7a   : > { %p1536_p5 = por %p1535_p2, %p1534_p13 }
  0x7b   : > { %595 = vperm.xlu1 %1448, %v1894_v38   ;;  %599 = vperm.xlu0 %1447, %v1891_v37   ;;  %v707_v37 = vpack.c.bf16 %v2072_v35, %v2069_v34 }
  0x7c   : > { %932 = vmatpush1.bf16.msra.mxu0 %v1496_v55  ;;  %1376 = vmatpush1.bf16.msra.mxu1 %v1496_v55  ;;  %v469_v55 = vlaneseq  ;;  %p1537_p4 = pnand %p1536_p5, %p1530_p6 }
  0x7f   : > { %934 = vmatmul.mubr.bf16.vlgmr.msra.gmra.mrb[0].mxu0 %v693_v0  ;;  %974 = vmatmul.mubr.bf16.vlgmr.msra.gmra.mrb[0].mxu1 %v701_v1  ;;  %v470_v1 = vshrl.u32 %v469_v55, 7 }
  0x80   : > { %943 = vmatprep.mubr.bf16.mxu0 %v696_v2  ;;  %983 = vmatprep.mubr.bf16.mxu1 %v704_v3 }
  0x81   : > { %603 = vperm.xlu1 %1448, %v1908_v42   ;;  %607 = vperm.xlu0 %1447, %v1905_v41  }
  0x85   : > { %611 = vperm.xlu1 %1448, %v1922_v46   ;;  %615 = vperm.xlu0 %1447, %v1919_v45  }
  0x87   : > { %944 = vmatmul.mubr.bf16.gmra.mrb[4].mxu0 %v695_v12  ;;  %984 = vmatmul.mubr.bf16.gmra.mrb[4].mxu1 %v703_v13  ;;  %v471_v12 = vsub.s32 0, %v470_v1  ;;  %v475_v13 = vsub.s32 1, %v470_v1 }
  0x88   : > { %953 = vmatprep.mubr.bf16.mxu0 %v698_v14  ;;  %993 = vmatprep.mubr.bf16.mxu1 %v706_v15  ;;  %v335_v14 = vld [vmem:[%s2593_s3] ss:$4 sm:$0x3] }
  0x8f   : > { %954 = vmatmul.mubr.bf16.gmra.mrb[8].mxu0 %v697_v28  ;;  %994 = vmatmul.mubr.bf16.gmra.mrb[8].mxu1 %v705_v29  ;;  %v2105_v28 = vrot.slane %v335_v14, %v471_v12  ;;  %v2107_v29 = vrot.slane %v335_v14, %v475_v13 }
  0x90   : > { %963 = vmatprep.mubr.bf16.mxu0 %v700_v30  ;;  %1003 = vmatprep.mubr.bf16.mxu1 %v708_v31  ;;  %v1302_v31 = vld [vmem:[%s2593_s3 + $0x2] ss:$4 sm:$0x3] }
  0x91   : > { %v2119_v1 = vrot.slane %v1302_v31, %v471_v12  ;;  %v2121_v27 = vrot.slane %v1302_v31, %v475_v13 }
  0x97   : > { %964 = vmatmul.mubr.bf16.gmra.mrb[12].mxu0 %v699_v36  ;;  %1004 = vmatmul.mubr.bf16.gmra.mrb[12].mxu1 %v707_v37  ;;  %v1301_v36 = vld [vmem:[%s2593_s3 + $0x1] ss:$4 sm:$0x3] }
  0x98   : > { %v2125_v35 = vrot.slane %v1301_v36, %v471_v12  ;;  %v2127_v33 = vrot.slane %v1301_v36, %v475_v13 }
  0xc5   : > { %v401_v38 = vpop.permute.xlu1 %400  ;;  %v391_v39 = vpop.permute.xlu0 %390 }
  0xc6   : > { %v483_v37 = vmul.f32 %v2105_v28, %v401_v38  ;;  %v484_v55 = vmul.f32 %v2107_v29, %v401_v38  ;;  %v479_v14 = vmul.f32 %v2105_v28, %v391_v39  ;;  %v480_v21 = vmul.f32 %v2107_v29, %v391_v39 }
  0xc8   : > { %v2142_v36 = vadd.f32 %v2119_v1, %v483_v37  ;;  %v2145_v9 = vadd.f32 %v2121_v27, %v484_v55  ;;  %v2150_v19 = vadd.f32 %v2119_v1, %v479_v14  ;;  %v2153_v17 = vadd.f32 %v2121_v27, %v480_v21 }
  0xc9   : > { %v406_v40 = vpop.permute.xlu1 %405  ;;  %v396_v41 = vpop.permute.xlu0 %395 }
  0xca   : > { %v485_v20 = vmul.f32 %v2105_v28, %v406_v40  ;;  %v486_v34 = vmul.f32 %v2107_v29, %v406_v40  ;;  %v481_v38 = vmul.f32 %v2105_v28, %v396_v41  ;;  %v482_v32 = vmul.f32 %v2107_v29, %v396_v41 }
  0xcc   : > { %v2158_v37 = vadd.f32 %v2119_v1, %v485_v20  ;;  %v2161_v55 = vadd.f32 %v2121_v27, %v486_v34  ;;  %v2164_v10 = vadd.f32 %v2119_v1, %v481_v38 }
  0xcd   : > { %v416_v42 = vpop.permute.xlu1 %415  ;;  %v411_v43 = vpop.permute.xlu0 %410 }
  0xce   : > { %v489_v11 = vmul.f32 %v2105_v28, %v416_v42  ;;  %v490_v39 = vmul.f32 %v2107_v29, %v416_v42  ;;  %v487_v12 = vmul.f32 %v2105_v28, %v411_v43  ;;  %v488_v13 = vmul.f32 %v2107_v29, %v411_v43 }
  0xd0   : > { %v2170_v14 = vadd.f32 %v2119_v1, %v489_v11  ;;  %v2173_v21 = vadd.f32 %v2121_v27, %v490_v39  ;;  %v2179_v20 = vadd.f32 %v2121_v27, %v488_v13 }
  0xd1   : > { %v426_v44 = vpop.permute.xlu1 %425  ;;  %v421_v45 = vpop.permute.xlu0 %420 }
  0xd2   : > { %v493_v40 = vmul.f32 %v2105_v28, %v426_v44  ;;  %v494_v41 = vmul.f32 %v2107_v29, %v426_v44  ;;  %v491_v42 = vmul.f32 %v2105_v28, %v421_v45  ;;  %v492_v43 = vmul.f32 %v2107_v29, %v421_v45 }
  0xd3   : > { %v2167_v44 = vadd.f32 %v2121_v27, %v482_v32  ;;  %v2176_v45 = vadd.f32 %v2119_v1, %v487_v12 }
  0xd4   : > { %v2184_v38 = vadd.f32 %v2119_v1, %v493_v40  ;;  %v2187_v32 = vadd.f32 %v2121_v27, %v494_v41  ;;  %v2194_v12 = vadd.f32 %v2119_v1, %v491_v42  ;;  %v2197_v13 = vadd.f32 %v2121_v27, %v492_v43 }
  0xd5   : > { %v436_v46 = vpop.permute.xlu1 %435  ;;  %v2078_v47 = vpop.permute.xlu0 %430 }
  0xd6   : > { %v497_v11 = vmul.f32 %v2105_v28, %v436_v46  ;;  %v498_v8 = vmul.f32 %v2107_v29, %v436_v46  ;;  %v495_v18 = vmul.f32 %v2105_v28, %v2078_v47  ;;  %v496_v40 = vmul.f32 %v2107_v29, %v2078_v47 }
  0xd8   : > { %v2223_v7 = vadd.f32 %v2121_v27, %v498_v8  ;;  %v2233_v62 = vadd.f32 %v2121_v27, %v496_v40 }
  0xd9   : > { %v2080_v48 = vpop.permute.xlu1 %445  ;;  %v2082_v49 = vpop.permute.xlu0 %440 }
  0xda   : > { %v501_v41 = vmul.f32 %v2105_v28, %v2080_v48  ;;  %v502_v46 = vmul.f32 %v2107_v29, %v2080_v48  ;;  %v499_v16 = vmul.f32 %v2105_v28, %v2082_v49  ;;  %v500_v42 = vmul.f32 %v2107_v29, %v2082_v49 }
  0xdb   : > { %v2220_v48 = vadd.f32 %v2119_v1, %v497_v11 }
  0xdc   : > { %v2240_v60 = vadd.f32 %v2119_v1, %v501_v41  ;;  %v2243_v6 = vadd.f32 %v2121_v27, %v502_v46 }
  0xdd   : > { %v2084_v50 = vpop.permute.xlu1 %455  ;;  %v2086_v51 = vpop.permute.xlu0 %450 }
  0xde   : > { %v505_v43 = vmul.f32 %v2105_v28, %v2084_v50  ;;  %v506_v63 = vmul.f32 %v2107_v29, %v2084_v50  ;;  %v503_v47 = vmul.f32 %v2105_v28, %v2086_v51  ;;  %v504_v61 = vmul.f32 %v2107_v29, %v2086_v51 }
  0xdf   : > { %v2230_v50 = vadd.f32 %v2119_v1, %v495_v18  ;;  %v2249_v18 = vadd.f32 %v2121_v27, %v500_v42 }
  0xe0   : > { %v2252_v4 = vadd.f32 %v2119_v1, %v505_v43 }
  0xe1   : > { %v2088_v52 = vpop.permute.xlu1 %465  ;;  %v2090_v53 = vpop.permute.xlu0 %460 }
  0xe2   : > { %v509_v49 = vmul.f32 %v2105_v28, %v2088_v52  ;;  %v510_v5 = vmul.f32 %v2107_v29, %v2088_v52  ;;  %v507_v51 = vmul.f32 %v2105_v28, %v2090_v53  ;;  %v508_v11 = vmul.f32 %v2107_v29, %v2090_v53 }
  0xe3   : > { %v2246_v52 = vadd.f32 %v2119_v1, %v499_v16  ;;  %v2255_v28 = vadd.f32 %v2121_v27, %v506_v63  ;;  %v2258_v53 = vadd.f32 %v2119_v1, %v503_v47  ;;  %v2261_v29 = vadd.f32 %v2121_v27, %v504_v61 }
  0xe4   : > { %v2264_v41 = vadd.f32 %v2119_v1, %v509_v49  ;;  %v2267_v16 = vadd.f32 %v2121_v27, %v510_v5  ;;  %v2274_v63 = vadd.f32 %v2119_v1, %v507_v51  ;;  %v2277_v43 = vadd.f32 %v2121_v27, %v508_v11 }
  0xe6   : > { %v2092_v54 = vpop.permute.xlu1 %559  ;;  %v2094_v0 = vpop.permute.xlu0 %555 }
  0xe7   : > { %v629_v46 = vmul.f32 %v2125_v35, %v2094_v0  ;;  %v630_v42 = vmul.f32 %v2127_v33, %v2094_v0  ;;  %v631_v61 = vmul.f32 %v2125_v35, %v2092_v54  ;;  %v632_v47 = vmul.f32 %v2127_v33, %v2092_v54 }
  0xe9   : > { %v661_v59 = vadd.f32 %v629_v46, %v2150_v19  ;;  %v662_v57 = vadd.f32 %v630_v42, %v2153_v17  ;;  %v2311_v22 = vadd.f32 %v632_v47, %v2167_v44 }
  0xea   : > { %v2096_v2 = vpop.permute.xlu1 %563  ;;  %v2098_v3 = vpop.permute.xlu0 %567 }
  0xeb   : > { %v633_v5 = vmul.f32 %v2125_v35, %v2096_v2  ;;  %v634_v49 = vmul.f32 %v2127_v33, %v2096_v2  ;;  %v635_v0 = vmul.f32 %v2125_v35, %v2098_v3  ;;  %v636_v1 = vmul.f32 %v2127_v33, %v2098_v3 }
  0xed   : > { %v2314_v58 = vadd.f32 %v633_v5, %v2142_v36  ;;  %v2320_v19 = vadd.f32 %v635_v0, %v2158_v37  ;;  %v2323_v17 = vadd.f32 %v636_v1, %v2161_v55 }
  0xee   : > { %v2103_v15 = vpop.permute.xlu1 %571  ;;  %v2109_v30 = vpop.permute.xlu0 %575 }
  0xef   : > { %v637_v27 = vmul.f32 %v2125_v35, %v2103_v15  ;;  %v638_v51 = vmul.f32 %v2127_v33, %v2103_v15  ;;  %v639_v54 = vmul.f32 %v2125_v35, %v2109_v30  ;;  %v640_v11 = vmul.f32 %v2127_v33, %v2109_v30 }
  0xf0   : > { %v663_v30 = vadd.f32 %v631_v61, %v2164_v10 }
  0xf1   : > { %v2326_v46 = vadd.f32 %v637_v27, %v2176_v45  ;;  %v2329_v10 = vadd.f32 %v638_v51, %v2179_v20  ;;  %v2335_v36 = vadd.f32 %v640_v11, %v2173_v21 }
  0xf2   : > { %v2129_v25 = vpop.permute.xlu1 %579  ;;  %v2135_v31 = vpop.permute.xlu0 %583 }
  0xf3   : > { %v641_v2 = vmul.f32 %v2125_v35, %v2129_v25  ;;  %v642_v23 = vmul.f32 %v2127_v33, %v2129_v25  ;;  %v643_v15 = vmul.f32 %v2125_v35, %v2135_v31  ;;  %v644_v24 = vmul.f32 %v2127_v33, %v2135_v31 }
  0xf4   : > { %v2317_v25 = vadd.f32 %v634_v49, %v2145_v9  ;;  %v2332_v31 = vadd.f32 %v639_v54, %v2170_v14 }
  0xf5   : > { %v2342_v55 = vadd.f32 %v641_v2, %v2194_v12  ;;  %v2345_v44 = vadd.f32 %v642_v23, %v2197_v13  ;;  %v2352_v20 = vadd.f32 %v643_v15, %v2184_v38  ;;  %v2355_v42 = vadd.f32 %v644_v24, %v2187_v32 }
  0xf6   : > { %v2181_v34 = vpop.permute.xlu1 %587  ;;  %v2191_v39 = vpop.permute.xlu0 %591 }
  0xf7   : > { %v645_v9 = vmul.f32 %v2125_v35, %v2181_v34  ;;  %v646_v37 = vmul.f32 %v2127_v33, %v2181_v34  ;;  %v647_v45 = vmul.f32 %v2125_v35, %v2191_v39  ;;  %v648_v14 = vmul.f32 %v2127_v33, %v2191_v39 }
  0xf9   : > { %v677_v49 = vadd.f32 %v645_v9, %v2230_v50  ;;  %v679_v1 = vadd.f32 %v647_v45, %v2220_v48 }
  0xfa   : > { %v596_v8 = vpop.permute.xlu1 %595  ;;  %v600_v40 = vpop.permute.xlu0 %599 }
  0xfb   : > { %v649_v34 = vmul.f32 %v2125_v35, %v596_v8  ;;  %v650_v12 = vmul.f32 %v2127_v33, %v596_v8  ;;  %v651_v23 = vmul.f32 %v2125_v35, %v600_v40  ;;  %v652_v13 = vmul.f32 %v2127_v33, %v600_v40 }
  0xfc   : > { %v678_v8 = vadd.f32 %v646_v37, %v2233_v62 }
  0xfd   : > { %v2374_v27 = vadd.f32 %v649_v34, %v2246_v52  ;;  %v2377_v51 = vadd.f32 %v650_v12, %v2249_v18  ;;  %v2380_v54 = vadd.f32 %v651_v23, %v2240_v60  ;;  %v2383_v50 = vadd.f32 %v652_v13, %v2243_v6  ;;  %v2695_v13 = vld [vmem:[#allocation13_spill] sm:$0xff] }
 0x100   : > { %v604_v26 = vpop.permute.xlu1 %603  ;;  %v608_v3 = vpop.permute.xlu0 %607 }
 0x101   : > { %v653_v47 = vmul.f32 %v2125_v35, %v604_v26  ;;  %v654_v39 = vmul.f32 %v2127_v33, %v604_v26  ;;  %v655_v5 = vmul.f32 %v2125_v35, %v608_v3  ;;  %v656_v38 = vmul.f32 %v2127_v33, %v608_v3 }
 0x102   : > { %v680_v26 = vadd.f32 %v648_v14, %v2223_v7 }
 0x103   : > { %v2389_v48 = vadd.f32 %v654_v39, %v2261_v29  ;;  %v2392_v7 = vadd.f32 %v655_v5, %v2252_v4  ;;  %v2395_v52 = vadd.f32 %v656_v38, %v2255_v28  ;;  %v2696_v39 = vld [vmem:[#allocation8_spill] sm:$0xff]  ;;  %v2697_v5 = vld [vmem:[#allocation10_spill] sm:$0xff] }
 0x104   : > { %v612_v21 = vpop.permute.xlu1 %611  ;;  %v616_v61 = vpop.permute.xlu0 %615 }
 0x105   : > { %v657_v24 = vmul.f32 %v2125_v35, %v612_v21  ;;  %v658_v32 = vmul.f32 %v2127_v33, %v612_v21  ;;  %v659_v0 = vmul.f32 %v2125_v35, %v616_v61  ;;  %v660_v40 = vmul.f32 %v2127_v33, %v616_v61 }
 0x106   : > { %v2386_v33 = vadd.f32 %v653_v47, %v2258_v53 }
 0x107   : > { %v2398_v6 = vadd.f32 %v657_v24, %v2274_v63  ;;  %v2401_v3 = vadd.f32 %v658_v32, %v2277_v43  ;;  %v2404_v4 = vadd.f32 %v659_v0, %v2264_v41  ;;  %v2407_v28 = vadd.f32 %v660_v40, %v2267_v16  ;;  %v2699_v40 = vld [vmem:[#allocation14_spill] sm:$0xff] }
 0x152   : > { %v935_v62 = vpop.f32.mrb[0].mxu0  ;;  %v975_v35 = vpop.f32.mrb[0].mxu1 }
 0x153   : > { %v936_v18 = vadd.f32 %v935_v62, %v661_v59  ;;  %v976_v60 = vadd.f32 %v975_v35, %v677_v49  ;;  %v937_v11 = vpop.f32.mrb[1].mxu0  ;;  %v977_v2 = vpop.f32.mrb[1].mxu1  ;;  %v2700_v62 = vld [vmem:[#allocation9_spill] sm:$0xff] }
 0x154   : > { %v938_v53 = vadd.f32 %v937_v11, %v662_v57  ;;  %v978_v15 = vadd.f32 %v977_v2, %v678_v8  ;;  %v939_v29 = vpop.f32.mrb[2].mxu0  ;;  %v979_v9 = vpop.f32.mrb[2].mxu1  ;;  %v2698_v8 = vld [vmem:[#allocation12_spill] sm:$0xff] }
 0x155   : > { %v1014_v59 = vmax.f32 %v936_v18, 0.0  ;;  %v1030_v37 = vmax.f32 %v976_v60, 0.0  ;;  %v940_v45 = vadd.f32 %v939_v29, %v663_v30  ;;  %v980_v14 = vadd.f32 %v979_v9, %v679_v1  ;;  %v941_v21 = vpop.f32.mrb[3].mxu0  ;;  %v981_v63 = vpop.f32.mrb[3].mxu1  ;;  %v2701_v18 = vld [vmem:[#allocation11_spill] sm:$0xff] }
 0x156   : > { %v1015_v34 = vmax.f32 %v938_v53, 0.0  ;;  %v1031_v12 = vmax.f32 %v978_v15, 0.0  ;;  %v942_v43 = vadd.f32 %v941_v21, %v2311_v22  ;;  %v982_v57 = vadd.f32 %v981_v63, %v680_v26 }
 0x157   : > { %v1046_v23 = vsub.f32 %v1014_v59, %v1955_v56  ;;  %v1062_v61 = vsub.f32 %v1030_v37, %v2695_v13  ;;  %v1016_v41 = vmax.f32 %v940_v45, 0.0  ;;  %v1032_v47 = vmax.f32 %v980_v14, 0.0 }
 0x158   : > { %v1047_v16 = vsub.f32 %v1015_v34, %v2696_v39  ;;  %v1063_v38 = vsub.f32 %v1031_v12, %v2697_v5  ;;  %v1017_v24 = vmax.f32 %v942_v43, 0.0  ;;  %v1033_v30 = vmax.f32 %v982_v57, 0.0 }
 0x159   : > { %v1078_v32 = vmul.f32 50.0, %v1046_v23  ;;  %v1094_v49 = vmul.f32 50.0, %v1062_v61  ;;  %v1048_v0 = vsub.f32 %v1016_v41, %v2698_v8  ;;  %v1064_v1 = vsub.f32 %v1032_v47, %v2699_v40 }
 0x15a   : > { %v1079_v22 = vmul.f32 50.0, %v1047_v16  ;;  %v1095_v26 = vmul.f32 50.0, %v1063_v38  ;;  %v1049_v35 = vsub.f32 %v1017_v24, %v2700_v62  ;;  %v1065_v60 = vsub.f32 %v1033_v30, %v2701_v18  ;;  %v945_v11 = vpop.f32.mrb[4].mxu0  ;;  %v985_v2 = vpop.f32.mrb[4].mxu1 }
 0x15b   : > { %v1110_v53 = vadd.f32 %v1078_v32, %v1955_v56  ;;  %v1126_v15 = vadd.f32 %v1094_v49, %v2695_v13  ;;  %v1080_v29 = vmul.f32 50.0, %v1048_v0  ;;  %v1096_v9 = vmul.f32 50.0, %v1064_v1  ;;  %v947_v59 = vpop.f32.mrb[5].mxu0  ;;  %v987_v37 = vpop.f32.mrb[5].mxu1  ;;  %v2703_v0 = vld [vmem:[#allocation21_spill] sm:$0xff] }
 0x15c   : > { %v1111_v45 = vadd.f32 %v1079_v22, %v2696_v39  ;;  %v1127_v14 = vadd.f32 %v1095_v26, %v2697_v5  ;;  %v1081_v21 = vmul.f32 50.0, %v1049_v35  ;;  %v1097_v63 = vmul.f32 50.0, %v1065_v60  ;;  %v949_v34 = vpop.f32.mrb[6].mxu0  ;;  %v989_v12 = vpop.f32.mrb[6].mxu1  ;;  %v2704_v22 = vld [vmem:[#allocation15_spill] sm:$0xff] }
 0x15d   : > { %1142 = vst [vmem:[%s2424_s25] sm:$0xff] %v1110_v53  ;;  %1158 = vst [vmem:[%s2424_s25 + $0x80] sm:$0xff] %v1126_v15  ;;  %v1112_v56 = vadd.f32 %v1080_v29, %v2698_v8  ;;  %v1128_v43 = vadd.f32 %v1096_v9, %v2699_v40  ;;  %v946_v57 = vadd.f32 %v945_v11, %v2314_v58  ;;  %v951_v13 = vpop.f32.mrb[7].mxu0  ;;  %v991_v61 = vpop.f32.mrb[7].mxu1  ;;  %v2702_v8 = vld [vmem:[#allocation19_spill] sm:$0xff]  ;;  %v2706_v53 = vld [vmem:[#allocation20_spill] sm:$0xff] }
 0x15e   : > { %v986_v23 = vadd.f32 %v985_v2, %v2374_v27  ;;  %1143 = vst [vmem:[%s2424_s25 + $0x8] sm:$0xff] %v1111_v45  ;;  %1159 = vst [vmem:[%s2424_s25 + $0x88] sm:$0xff] %v1127_v14  ;;  %v1113_v41 = vadd.f32 %v1081_v21, %v2700_v62  ;;  %v1129_v47 = vadd.f32 %v1097_v63, %v2701_v18  ;;  %v2705_v62 = vld [vmem:[#allocation17_spill] sm:$0xff]  ;;  %v2707_v15 = vld [vmem:[#allocation22_spill] sm:$0xff] }
 0x15f   : > { %v948_v39 = vadd.f32 %v947_v59, %v2317_v25  ;;  %v988_v16 = vadd.f32 %v987_v37, %v2377_v51  ;;  %1144 = vst [vmem:[%s2424_s25 + $0x10] sm:$0xff] %v1112_v56  ;;  %1160 = vst [vmem:[%s2424_s25 + $0x90] sm:$0xff] %v1128_v43  ;;  %v1018_v5 = vmax.f32 %v946_v57, 0.0  ;;  %v950_v38 = vadd.f32 %v949_v34, %v2320_v19  ;;  %v2708_v45 = vld [vmem:[#allocation16_spill] sm:$0xff]  ;;  %v2709_v21 = vld [vmem:[#allocation18_spill] sm:$0xff] }
 0x160   : > { %v1034_v58 = vmax.f32 %v986_v23, 0.0  ;;  %v990_v27 = vadd.f32 %v989_v12, %v2380_v54  ;;  %1145 = vst [vmem:[%s2424_s25 + $0x18] sm:$0xff] %v1113_v41  ;;  %1161 = vst [vmem:[%s2424_s25 + $0x98] sm:$0xff] %v1129_v47  ;;  %v952_v32 = vadd.f32 %v951_v13, %v2323_v17  ;;  %v992_v49 = vadd.f32 %v991_v61, %v2383_v50 }
 0x161   : > { %v1019_v24 = vmax.f32 %v948_v39, 0.0  ;;  %v1035_v30 = vmax.f32 %v988_v16, 0.0  ;;  %v1050_v25 = vsub.f32 %v1018_v5, %v2702_v8  ;;  %v1020_v40 = vmax.f32 %v950_v38, 0.0 }
 0x162   : > { %v1066_v51 = vsub.f32 %v1034_v58, %v2703_v0  ;;  %v1036_v1 = vmax.f32 %v990_v27, 0.0  ;;  %v1021_v35 = vmax.f32 %v952_v32, 0.0  ;;  %v1037_v54 = vmax.f32 %v992_v49, 0.0  ;;  %v955_v18 = vpop.f32.mrb[8].mxu0  ;;  %v995_v60 = vpop.f32.mrb[8].mxu1 }
 0x163   : > { %v1051_v26 = vsub.f32 %v1019_v24, %v2704_v22  ;;  %v1067_v19 = vsub.f32 %v1035_v30, %v2705_v62  ;;  %v1082_v11 = vmul.f32 50.0, %v1050_v25  ;;  %v1052_v17 = vsub.f32 %v1020_v40, %v2706_v53  ;;  %v957_v29 = vpop.f32.mrb[9].mxu0  ;;  %v997_v9 = vpop.f32.mrb[9].mxu1 }
 0x164   : > { %v1098_v2 = vmul.f32 50.0, %v1066_v51  ;;  %v1068_v50 = vsub.f32 %v1036_v1, %v2707_v15  ;;  %v1053_v14 = vsub.f32 %v1021_v35, %v2708_v45  ;;  %v1069_v63 = vsub.f32 %v1037_v54, %v2709_v21  ;;  %v959_v34 = vpop.f32.mrb[10].mxu0  ;;  %v999_v12 = vpop.f32.mrb[10].mxu1 }
 0x165   : > { %v1083_v59 = vmul.f32 50.0, %v1051_v26  ;;  %v1099_v37 = vmul.f32 50.0, %v1067_v19  ;;  %v1114_v56 = vadd.f32 %v1082_v11, %v2702_v8  ;;  %v1084_v57 = vmul.f32 50.0, %v1052_v17  ;;  %v961_v13 = vpop.f32.mrb[11].mxu0  ;;  %v1001_v61 = vpop.f32.mrb[11].mxu1  ;;  %v2710_v26 = vld [vmem:[#allocation27_spill] sm:$0xff] }
 0x166   : > { %v1130_v43 = vadd.f32 %v1098_v2, %v2703_v0  ;;  %v1100_v23 = vmul.f32 50.0, %v1068_v50  ;;  %v1085_v39 = vmul.f32 50.0, %v1053_v14  ;;  %v1101_v16 = vmul.f32 50.0, %v1069_v63  ;;  %v2713_v11 = vld [vmem:[#allocation25_spill] sm:$0xff] }
 0x167   : > { %v1115_v41 = vadd.f32 %v1083_v59, %v2704_v22  ;;  %v1131_v47 = vadd.f32 %v1099_v37, %v2705_v62  ;;  %1146 = vst [vmem:[%s2424_s25 + $0x20] sm:$0xff] %v1114_v56  ;;  %v1116_v5 = vadd.f32 %v1084_v57, %v2706_v53  ;;  %v956_v38 = vadd.f32 %v955_v18, %v2326_v46  ;;  %v2711_v62 = vld [vmem:[#allocation29_spill] sm:$0xff]  ;;  %v2715_v59 = vld [vmem:[#allocation30_spill] sm:$0xff] }
 0x168   : > { %1162 = vst [vmem:[%s2424_s25 + $0xa0] sm:$0xff] %v1130_v43  ;;  %v1132_v58 = vadd.f32 %v1100_v23, %v2707_v15  ;;  %v996_v27 = vadd.f32 %v995_v60, %v2386_v33  ;;  %v1117_v24 = vadd.f32 %v1085_v39, %v2708_v45  ;;  %v1133_v30 = vadd.f32 %v1101_v16, %v2709_v21  ;;  %v2712_v60 = vld [vmem:[#allocation23_spill] sm:$0xff]  ;;  %v2717_v56 = vld [vmem:[#allocation26_spill] sm:$0xff] }
 0x169   : > { %1147 = vst [vmem:[%s2424_s25 + $0x28] sm:$0xff] %v1115_v41  ;;  %1163 = vst [vmem:[%s2424_s25 + $0xa8] sm:$0xff] %v1131_v47  ;;  %v958_v32 = vadd.f32 %v957_v29, %v2329_v10  ;;  %v998_v49 = vadd.f32 %v997_v9, %v2389_v48  ;;  %v1022_v8 = vmax.f32 %v956_v38, 0.0  ;;  %v960_v0 = vadd.f32 %v959_v34, %v2332_v31  ;;  %v2714_v29 = vld [vmem:[#allocation28_spill] sm:$0xff] }
 0x16a   : > { %1148 = vst [vmem:[%s2424_s25 + $0x30] sm:$0xff] %v1116_v5  ;;  %1164 = vst [vmem:[%s2424_s25 + $0xb0] sm:$0xff] %v1132_v58  ;;  %v1038_v25 = vmax.f32 %v996_v27, 0.0  ;;  %v1000_v46 = vadd.f32 %v999_v12, %v2392_v7  ;;  %v962_v40 = vadd.f32 %v961_v13, %v2335_v36  ;;  %v1002_v1 = vadd.f32 %v1001_v61, %v2395_v52  ;;  %v965_v22 = vpop.f32.mrb[12].mxu0  ;;  %v1005_v10 = vpop.f32.mrb[12].mxu1  ;;  %v2716_v34 = vld [vmem:[#allocation24_spill] sm:$0xff] }
 0x16b   : > { %1149 = vst [vmem:[%s2424_s25 + $0x38] sm:$0xff] %v1117_v24  ;;  %1165 = vst [vmem:[%s2424_s25 + $0xb8] sm:$0xff] %v1133_v30  ;;  %v1023_v33 = vmax.f32 %v958_v32, 0.0  ;;  %v1039_v51 = vmax.f32 %v998_v49, 0.0  ;;  %v1054_v48 = vsub.f32 %v1022_v8, %v2710_v26  ;;  %v1024_v35 = vmax.f32 %v960_v0, 0.0  ;;  %v967_v18 = vpop.f32.mrb[13].mxu0 }
 0x16c   : > { %v1070_v19 = vsub.f32 %v1038_v25, %v2711_v62  ;;  %v1040_v54 = vmax.f32 %v1000_v46, 0.0  ;;  %v1007_v31 = vpop.f32.mrb[13].mxu1  ;;  %v1025_v53 = vmax.f32 %v962_v40, 0.0  ;;  %v1041_v17 = vmax.f32 %v1002_v1, 0.0  ;;  %v969_v15 = vpop.f32.mrb[14].mxu0  ;;  %v2718_v40 = vld [vmem:[#allocation35_spill] sm:$0xff] }
 0x16d   : > { %v1055_v7 = vsub.f32 %v1023_v33, %v2712_v60  ;;  %v1071_v2 = vsub.f32 %v1039_v51, %v2713_v11  ;;  %v1009_v36 = vpop.f32.mrb[14].mxu1  ;;  %v1086_v50 = vmul.f32 50.0, %v1054_v48  ;;  %v1056_v9 = vsub.f32 %v1024_v35, %v2714_v29  ;;  %v971_v45 = vpop.f32.mrb[15].mxu0  ;;  %v2719_v1 = vld [vmem:[#allocation37_spill] sm:$0xff] }
 0x16e   : > { %v1102_v52 = vmul.f32 50.0, %v1070_v19  ;;  %v1072_v37 = vsub.f32 %v1040_v54, %v2715_v59  ;;  %v1011_v14 = vpop.f32.mrb[15].mxu1  ;;  %v1057_v12 = vsub.f32 %v1025_v53, %v2716_v34  ;;  %v1073_v43 = vsub.f32 %v1041_v17, %v2717_v56  ;;  %v2721_v48 = vld [vmem:[#allocation33_spill] sm:$0xff]  ;;  %v2725_v53 = vld [vmem:[#allocation34_spill] sm:$0xff] }
 0x16f   : > { %v1087_v21 = vmul.f32 50.0, %v1055_v7  ;;  %v1103_v63 = vmul.f32 50.0, %v1071_v2  ;;  %v1118_v57 = vadd.f32 %v1086_v50, %v2710_v26  ;;  %v1088_v13 = vmul.f32 50.0, %v1056_v9  ;;  %v2720_v26 = vld [vmem:[#allocation31_spill] sm:$0xff] }
 0x170   : > { %v1134_v23 = vadd.f32 %v1102_v52, %v2711_v62  ;;  %v1104_v61 = vmul.f32 50.0, %v1072_v37  ;;  %v1089_v39 = vmul.f32 50.0, %v1057_v12  ;;  %v1105_v16 = vmul.f32 50.0, %v1073_v43 }
 0x171   : > { %v1119_v41 = vadd.f32 %v1087_v21, %v2712_v60  ;;  %v1135_v47 = vadd.f32 %v1103_v63, %v2713_v11  ;;  %1150 = vst [vmem:[%s2424_s25 + $0x40] sm:$0xff] %v1118_v57  ;;  %v1120_v5 = vadd.f32 %v1088_v13, %v2714_v29  ;;  %v966_v38 = vadd.f32 %v965_v22, %v2342_v55  ;;  %v2724_v11 = vld [vmem:[#allocation32_spill] sm:$0xff] }
 0x172   : > { %1166 = vst [vmem:[%s2424_s25 + $0xc0] sm:$0xff] %v1134_v23  ;;  %v1136_v58 = vadd.f32 %v1104_v61, %v2715_v59  ;;  %v1006_v27 = vadd.f32 %v1005_v10, %v2398_v6  ;;  %v1121_v24 = vadd.f32 %v1089_v39, %v2716_v34  ;;  %v1137_v30 = vadd.f32 %v1105_v16, %v2717_v56 }
 0x173   : > { %1151 = vst [vmem:[%s2424_s25 + $0x48] sm:$0xff] %v1119_v41  ;;  %1167 = vst [vmem:[%s2424_s25 + $0xc8] sm:$0xff] %v1135_v47  ;;  %v968_v32 = vadd.f32 %v967_v18, %v2345_v44  ;;  %v1008_v49 = vadd.f32 %v1007_v31, %v2401_v3  ;;  %v1026_v8 = vmax.f32 %v966_v38, 0.0  ;;  %v970_v0 = vadd.f32 %v969_v15, %v2352_v20  ;;  %v2722_v18 = vld [vmem:[#allocation36_spill] sm:$0xff]  ;;  %v2723_v31 = vld [vmem:[#allocation38_spill] sm:$0xff] }
 0x174   : > { %1152 = vst [vmem:[%s2424_s25 + $0x50] sm:$0xff] %v1120_v5  ;;  %1168 = vst [vmem:[%s2424_s25 + $0xd0] sm:$0xff] %v1136_v58  ;;  %v1042_v25 = vmax.f32 %v1006_v27, 0.0  ;;  %v1010_v55 = vadd.f32 %v1009_v36, %v2404_v4  ;;  %v972_v33 = vadd.f32 %v971_v45, %v2355_v42  ;;  %v1012_v51 = vadd.f32 %v1011_v14, %v2407_v28 }
 0x175   : > { %1153 = vst [vmem:[%s2424_s25 + $0x58] sm:$0xff] %v1121_v24  ;;  %1169 = vst [vmem:[%s2424_s25 + $0xd8] sm:$0xff] %v1137_v30  ;;  %v1027_v6 = vmax.f32 %v968_v32, 0.0  ;;  %v1043_v46 = vmax.f32 %v1008_v49, 0.0  ;;  %v1058_v44 = vsub.f32 %v1026_v8, %v2718_v40  ;;  %v1028_v22 = vmax.f32 %v970_v0, 0.0 }
 0x176   : > { %v1074_v3 = vsub.f32 %v1042_v25, %v2719_v1  ;;  %v1044_v10 = vmax.f32 %v1010_v55, 0.0  ;;  %v1029_v62 = vmax.f32 %v972_v33, 0.0  ;;  %v1045_v19 = vmax.f32 %v1012_v51, 0.0 }
 0x177   : > { %v1059_v20 = vsub.f32 %v1027_v6, %v2720_v26  ;;  %v1075_v4 = vsub.f32 %v1043_v46, %v2721_v48  ;;  %v1090_v35 = vmul.f32 50.0, %v1058_v44  ;;  %v1060_v42 = vsub.f32 %v1028_v22, %v2722_v18 }
 0x178   : > { %v1106_v54 = vmul.f32 50.0, %v1074_v3  ;;  %v1076_v28 = vsub.f32 %v1044_v10, %v2723_v31  ;;  %v1061_v2 = vsub.f32 %v1029_v62, %v2724_v11  ;;  %v1077_v17 = vsub.f32 %v1045_v19, %v2725_v53 }
 0x179   : > { %v1091_v60 = vmul.f32 50.0, %v1059_v20  ;;  %v1107_v7 = vmul.f32 50.0, %v1075_v4  ;;  %v1122_v15 = vadd.f32 %v1090_v35, %v2718_v40  ;;  %v1092_v50 = vmul.f32 50.0, %v1060_v42 }
 0x17a   : > { %v1138_v36 = vadd.f32 %v1106_v54, %v2719_v1  ;;  %v1108_v52 = vmul.f32 50.0, %v1076_v28  ;;  %v1093_v59 = vmul.f32 50.0, %v1061_v2  ;;  %v1109_v37 = vmul.f32 50.0, %v1077_v17 }
 0x17b   : > { %v1123_v29 = vadd.f32 %v1091_v60, %v2720_v26  ;;  %v1139_v9 = vadd.f32 %v1107_v7, %v2721_v48  ;;  %1154 = vst [vmem:[%s2424_s25 + $0x60] sm:$0xff] %v1122_v15  ;;  %v1124_v45 = vadd.f32 %v1092_v50, %v2722_v18 }
 0x17c   : > { %1170 = vst [vmem:[%s2424_s25 + $0xe0] sm:$0xff] %v1138_v36  ;;  %v1140_v14 = vadd.f32 %v1108_v52, %v2723_v31  ;;  %v1125_v21 = vadd.f32 %v1093_v59, %v2724_v11  ;;  %v1141_v63 = vadd.f32 %v1109_v37, %v2725_v53 }
 0x17d   : > { %1155 = vst [vmem:[%s2424_s25 + $0x68] sm:$0xff] %v1123_v29  ;;  %1171 = vst [vmem:[%s2424_s25 + $0xe8] sm:$0xff] %v1139_v9 }
 0x17e   : > { %1156 = vst [vmem:[%s2424_s25 + $0x70] sm:$0xff] %v1124_v45  ;;  %1172 = vst [vmem:[%s2424_s25 + $0xf0] sm:$0xff] %v1140_v14 }
 0x17f   : > { %1157 = vst [vmem:[%s2424_s25 + $0x78] sm:$0xff] %v1125_v21  ;;  %1173 = vst [vmem:[%s2424_s25 + $0xf8] sm:$0xff] %v1141_v63 }
 0x180   : > { %1540 = shalt.err (!%p1537_p4)
}
 0x181   : > { %s1541_s27 = scalar_lea.hbm %s2531_s12, 4096  ;;  %s1545_s9 = scalar_lea.hbm %s2594_s4, 8192 }
 0x182   : > { %p1542_p7 = scmp.ne.s32.totalorder %s2531_s12, %s1541_s27  ;;  %p1546_p1 = scmp.lt.u32.totalorder %s2531_s12, %s2594_s4 }
 0x183   : > { %p1547_p3 = scmp.lt.u32.totalorder %s1545_s9, %s1541_s27  ;;  %p1549_p9 = scmp.lt.u32.totalorder %s1541_s27, %s2531_s12 }
 0x184   : > { %p1543_p10 = pnand %p1542_p7, %p2726_p11 }
 0x185   : > { %p1548_p8 = por %p1547_p3, %p1546_p1 }
 0x186   : > { %p1544_p12 = pneg %p1543_p10 }
 0x187   : > { %p1550_p0 = por %p1549_p9, %p1548_p8 }
 0x189   : > { %p1551_p6 = pnand %p1550_p0, %p1544_p12 }
 0x18b   : > { %1554 = shalt.err (!%p1551_p6)
}
 0x18c   : > { %s1617_s24 = smov 256   ;;  %s1618_s18 = smov 16  }
 0x18d   : > { %1379 = dma.vmem_to_hbm [thread:$0]  (%p2726_p11), %s2533_s13, 4096, %s2531_s12, %s1175_s14, %s1617_s24, %s1617_s24, %s1618_s18  }
 0x18e PF: > { %s1204_s10 = sand.u32 1, %s1589_s15   ;;  %p2727_p13 = scmp.ne.s32.totalorder %s2661_s30, 0 }
 0x18f   : > { %p2728_p2 = scmp.ge.s32.totalorder %s1609_s20, 2  ;;  %s1205_s6 = scalar_lea.sflag [#allocation4], %s1204_s10 }
 0x191   : > { %p1386_p5 = pnand %p2728_p2, %p2727_p13 }
 0x193   : > { %1584 = dma.done.wait (!%p1386_p5), %s1205_s6, 4096  }
 0x194   : > { %1586 = vsyncadd (!%p1386_p5), %s1205_s6, 4294963200  ;;  %s20_s20 = sadd.s32 1, %s1609_s20   ;;  %s2729_s15 = smov %s1593_s16 }
 0x195   : > { %p17_p4 = scmp.ge.s32.totalorder %s20_s20, 4   ;;  %s2730_s16 = smov %s1597_s17 }
 0x196   : > { %s2731_s17 = smov %s1700_s29  ;;  %s2732_s18 = smov %s1605_s19 }
 0x197   : > { %s2733_s19 = smov %s2735_s23  ;;  %19 = sbr.rel (!%p17_p4) target bundleno = 6 (0x6), region = 90 }
 0x19e   :  { %1210 = vsyncpa [#allocation3], 1 }
 0x19f   :  { %1212 = vsyncpa [#allocation3 + $0x1], 1 }
 0x1a0   :  { %1213 = vsyncpa [#allocation4], 1 }
 0x1a1   :  { %1215 = vsyncpa [#allocation4 + $0x1], 1 }

</bundles_post_ra>
